<compile_context>
chip_gen: v7x
topology: tpu7x:2x2x1
jax: 0.10.0
libtpu: 0.0.40
codegen_flags: <defaults>
</compile_context>

<pallas_src>
import functools

import jax
import jax.numpy as jnp
from jax import lax
from jax.experimental import pallas as pl
from jax.experimental.pallas import tpu as pltpu


# ----------------------------- kernel -------------------------------------- #

def _fused_attention_kernel(xq_ref, xkv_ref, wq_ref, wkv_ref, wo_ref, bo_ref,
                            o_ref, m_sc, l_sc, acc_sc, *,
                            heads, dim_head, scale):
    """One (batch, q_tile, kv_tile) grid step.

    xq_ref  : (1, TQ, D)     query rows of x for this (batch, q-tile)
    xkv_ref : (1, TK, D)     key/value rows of x for this kv-tile
    wq_ref  : (D, H*Dh)      Q projection (all heads fused, lane-dense)
    wkv_ref : (D, 2*H*Dh)    K|V projection (concatenated)
    wo_ref  : (H*Dh, D)      output projection
    bo_ref  : (1, D)         output bias
    o_ref   : (1, TQ, D)     final output tile (written on last kv step)
    m_sc/l_sc : (H, TQ, 1)   online-softmax running max / sum (f32 scratch)
    acc_sc    : (H, TQ, Dh)  online-softmax running A@V accumulator (f32)
    """
    inner = heads * dim_head
    ki = pl.program_id(2)

    @pl.when(ki == 0)
    def _init():
        m_sc[...] = jnp.full_like(m_sc, -jnp.inf)
        l_sc[...] = jnp.zeros_like(l_sc)
        acc_sc[...] = jnp.zeros_like(acc_sc)

    xq = xq_ref[0]                       # (TQ, D), native dtype (bf16 OK)
    xkv = xkv_ref[0]                     # (TK, D)

    # Lane-dense fused projections for all heads at once; scale folded into q.
    q = (jnp.dot(xq, wq_ref[...], preferred_element_type=jnp.float32)
         * scale).astype(xq.dtype)                                      # (TQ, H*Dh)
    kv = jnp.dot(xkv, wkv_ref[...],
                 preferred_element_type=jnp.float32).astype(xkv.dtype)  # (TK, 2*H*Dh)
    k = kv[:, :inner]
    v = kv[:, inner:]

    # Per-head online softmax on VMEM-resident slices (no grid axis per head,
    # no re-fetch of x per head).
    for h in range(heads):
        sl = slice(h * dim_head, (h + 1) * dim_head)
        qh, kh, vh = q[:, sl], k[:, sl], v[:, sl]
        # QK^T contracting the last dims of both operands (no transpose copy).
        s = lax.dot_general(qh, kh, (((1,), (1,)), ((), ())),
                            preferred_element_type=jnp.float32)         # (TQ, TK)
        m_prev = m_sc[h]                                                # (TQ, 1)
        m_new = jnp.maximum(m_prev, jnp.max(s, axis=-1, keepdims=True))
        alpha = jnp.exp(m_prev - m_new)
        p = jnp.exp(s - m_new)
        l_sc[h] = alpha * l_sc[h] + jnp.sum(p, axis=-1, keepdims=True)
        acc_sc[h] = alpha * acc_sc[h] + jnp.dot(
            p.astype(vh.dtype), vh, preferred_element_type=jnp.float32)
        m_sc[h] = m_new

    @pl.when(ki == pl.num_programs(2) - 1)
    def _finalize():
        tq = acc_sc.shape[1]
        d_out = wo_ref.shape[1]
        wo = wo_ref[...]                                                # (H*Dh, D)
        # Fused output projection + bias:  y = b + sum_h (acc_h / l_h) @ Wo_h.
        y = jnp.broadcast_to(bo_ref[...], (tq, d_out)).astype(jnp.float32)
        for h in range(heads):
            inv_l = pl.reciprocal(l_sc[h], approx=True)                 # EUP slot
            oh = (acc_sc[h] * inv_l).astype(wo.dtype)                   # (TQ, Dh)
            y = y + jnp.dot(oh, wo[h * dim_head:(h + 1) * dim_head, :],
                            preferred_element_type=jnp.float32)
        o_ref[0] = y.astype(o_ref.dtype)


# ----------------------------- wrapper ------------------------------------- #

def attention_forward(x, w_q, w_kv, w_out, b_out, *, heads, dim_head, scale,
                      q_tile=256, kv_tile=512, out_attention=False):
    """x: [B, N, D]; w_q: [D, H*Dh]; w_kv: [D, 2*H*Dh] (K|V concatenated);
    w_out: [H*Dh, D]; b_out: [1, D]."""
    B, N, D = x.shape
    inner = heads * dim_head
    assert w_q.shape == (D, inner)
    assert w_kv.shape == (D, 2 * inner)
    assert w_out.shape == (inner, D)
    assert b_out.shape == (1, D)

    tq = min(q_tile, N)
    tk = min(kv_tile, N)
    # TODO(synk): ragged sequence tails (N % tile != 0) would need score masking.
    assert N % tq == 0 and N % tk == 0, "sequence length must divide the tiles"

    kernel = functools.partial(_fused_attention_kernel,
                               heads=heads, dim_head=dim_head, scale=scale)

    out = pl.pallas_call(
        kernel,
        out_shape=jax.ShapeDtypeStruct((B, N, D), x.dtype),
        grid_spec=pltpu.PrefetchScalarGridSpec(
            num_scalar_prefetch=0,
            grid=(B, N // tq, N // tk),
            in_specs=[
                # q rows of x: changes only with (batch, q-tile) -> fetched once
                pl.BlockSpec((1, tq, D), lambda bi, qi, ki: (bi, qi, 0)),
                # kv rows of x: streamed along the kv axis
                pl.BlockSpec((1, tk, D), lambda bi, qi, ki: (bi, ki, 0)),
                # weights/bias: constant index -> resident in VMEM across grid
                pl.BlockSpec((D, inner), lambda bi, qi, ki: (0, 0)),
                pl.BlockSpec((D, 2 * inner), lambda bi, qi, ki: (0, 0)),
                pl.BlockSpec((inner, D), lambda bi, qi, ki: (0, 0)),
                pl.BlockSpec((1, D), lambda bi, qi, ki: (0, 0)),
            ],
            out_specs=pl.BlockSpec((1, tq, D), lambda bi, qi, ki: (bi, qi, 0)),
            scratch_shapes=[
                pltpu.VMEM((heads, tq, 1), jnp.float32),         # running max
                pltpu.VMEM((heads, tq, 1), jnp.float32),         # running sum
                pltpu.VMEM((heads, tq, dim_head), jnp.float32),  # running A@V
            ],
        ),
        compiler_params=pltpu.CompilerParams(
            # batch & q-tile axes parallel (megacore / v7x 2-TC), kv axis is the
            # online-softmax reduction.
            dimension_semantics=("parallel", "parallel", "arbitrary"),
            # Conservative cross-generation limit; raise for bigger tiles on
            # v5e/v6e (128 MiB physical VMEM).
            vmem_limit_bytes=32 * 1024 * 1024,
        ),
    )(x, x, w_q, w_kv, w_out, b_out)

    if out_attention:
        # TODO(synk): attention weights are never materialized by this fused
        # flash-style kernel; only the out_attention=False output is produced.
        return out
    return out


# ----------------------------- reference ----------------------------------- #

def attention_reference(x, w_qkv, w_out_torch, b_out, *, heads, dim_head, scale):
    """Pure-JAX mirror of the PyTorch module (torch weight layouts)."""
    inner = heads * dim_head
    qkv = jnp.einsum('bnd,ed->bne', x, w_qkv)                 # x @ W_qkv^T
    q, k, v = (qkv[..., :inner], qkv[..., inner:2 * inner], qkv[..., 2 * inner:])

    def split(t):
        b, n, _ = t.shape
        return jnp.transpose(t.reshape(b, n, heads, dim_head), (0, 2, 1, 3))

    q, k, v = split(q), split(k), split(v)
    dots = jnp.einsum('bhid,bhjd->bhij', q, k) * scale
    attn = jax.nn.softmax(dots, axis=-1)
    out = jnp.einsum('bhij,bhjd->bhid', attn, v)
    b, h, n, d = out.shape
    out = jnp.transpose(out, (0, 2, 1, 3)).reshape(b, n, h * d)
    return jnp.einsum('bne,de->bnd', out, w_out_torch) + b_out


# ----------------------------- main ---------------------------------------- #

if __name__ == "__main__":
    # Small shapes consistent with the module: dim=32, heads=2, dim_head=16.
    B, N, dim = 2, 8, 32
    heads, dim_head = 2, 16
    inner_dim = heads * dim_head
    scale = dim_head ** (-0.5)

    key = jax.random.PRNGKey(0)
    kx, kqkv, kwo, kbo = jax.random.split(key, 4)

    x = jax.random.normal(kx, (B, N, dim), dtype=jnp.float32)

    # to_qkv: Linear(dim, 3*inner, bias=False); PyTorch weight (3*inner, dim).
    w_qkv = jax.random.normal(kqkv, (3 * inner_dim, dim), dtype=jnp.float32) * 0.1
    # y = x @ W^T then chunk(3, -1); column order inside each chunk is (h d).
    w_q = w_qkv[0 * inner_dim:1 * inner_dim].T               # (dim, inner)
    w_k = w_qkv[1 * inner_dim:2 * inner_dim].T
    w_v = w_qkv[2 * inner_dim:3 * inner_dim].T
    w_kv = jnp.concatenate([w_k, w_v], axis=1)               # (dim, 2*inner)

    # to_out: Linear(inner, dim); PyTorch weight (dim, inner), bias (dim,).
    # nn.Dropout is identity (p=0.0 / eval semantics).
    w_out_torch = jax.random.normal(kwo, (dim, inner_dim), dtype=jnp.float32) * 0.1
    b_out_vec = jax.random.normal(kbo, (dim,), dtype=jnp.float32) * 0.1
    w_out = w_out_torch.T                  # (inner, dim)
    b_out = b_out_vec.reshape(1, dim)      # (1, dim) for 2-D VMEM layout

    out = attention_forward(x, w_q, w_kv, w_out, b_out,
                            heads=heads, dim_head=dim_head, scale=scale)
    out = jax.block_until_ready(out)

    ref = attention_reference(x, w_qkv, w_out_torch, b_out_vec,
                              heads=heads, dim_head=dim_head, scale=scale)
    assert out.shape == (B, N, dim)
    # pl.reciprocal(approx=True) in the softmax denominator -> slightly looser
    # tolerance than exact division.
    assert jnp.allclose(out, ref, atol=2e-3, rtol=2e-3), "mismatch vs reference"

    print("KERNEL_OK")
</pallas_src>

<mosaic_0001>
module attributes {stable_mosaic.version = 11 : i64} {
  func.func @_fused_attention_kernel(%arg0: i32, %arg1: i32, %arg2: i32, %arg3: memref<1x8x32xf32, #tpu.memory_space<vmem>>, %arg4: memref<1x8x32xf32, #tpu.memory_space<vmem>>, %arg5: memref<32x32xf32, #tpu.memory_space<vmem>>, %arg6: memref<32x64xf32, #tpu.memory_space<vmem>>, %arg7: memref<32x32xf32, #tpu.memory_space<vmem>>, %arg8: memref<1x32xf32, #tpu.memory_space<vmem>>, %arg9: memref<1x8x32xf32, #tpu.memory_space<vmem>>, %arg10: memref<2x8x1xf32, #tpu.memory_space<vmem>>, %arg11: memref<2x8x1xf32, #tpu.memory_space<vmem>>, %arg12: memref<2x8x16xf32, #tpu.memory_space<vmem>>) attributes {dimension_semantics = [#tpu.dimension_semantics<parallel>, #tpu.dimension_semantics<parallel>, #tpu.dimension_semantics<arbitrary>], iteration_bounds = array<i64: 2, 1, 1>, scalar_prefetch = 0 : i64, scratch_operands = 3 : i64, tpu.core_type = #tpu.core_type<tc>, window_params = [{transform_indices = @transform_0, window_bounds = array<i64: 1, 8, 32>}, {transform_indices = @transform_1, window_bounds = array<i64: 1, 8, 32>}, {pipeline_mode = #tpu.pipeline_mode<synchronous>, transform_indices = @transform_2, window_bounds = array<i64: 32, 32>}, {pipeline_mode = #tpu.pipeline_mode<synchronous>, transform_indices = @transform_3, window_bounds = array<i64: 32, 64>}, {pipeline_mode = #tpu.pipeline_mode<synchronous>, transform_indices = @transform_4, window_bounds = array<i64: 32, 32>}, {pipeline_mode = #tpu.pipeline_mode<synchronous>, transform_indices = @transform_5, window_bounds = array<i64: 1, 32>}, {transform_indices = @transform_6, window_bounds = array<i64: 1, 8, 32>}]} {
    %c0_i32 = arith.constant 0 : i32
    %0 = arith.cmpi eq, %arg2, %c0_i32 : i32
    %1 = arith.extui %0 : i1 to i32
    %c0_i32_0 = arith.constant 0 : i32
    %2 = arith.cmpi ne, %1, %c0_i32_0 : i32
    scf.if %2 {
      %cst_57 = arith.constant 0xFF800000 : f32
      %88 = vector.broadcast %cst_57 : f32 to vector<2x8x1xf32>
      %c0_58 = arith.constant 0 : index
      %c0_59 = arith.constant 0 : index
      %c0_60 = arith.constant 0 : index
      %89 = vector.load %arg10[%c0_58, %c0_59, %c0_60] : memref<2x8x1xf32, #tpu.memory_space<vmem>>, vector<2x8x1xf32>
      tpu.vector_store %arg10[%c0_58, %c0_59, %c0_60], %88 {strides = array<i32>} : memref<2x8x1xf32, #tpu.memory_space<vmem>>, vector<2x8x1xf32>,
      %cst_61 = arith.constant 0.000000e+00 : f32
      %90 = vector.broadcast %cst_61 : f32 to vector<2x8x1xf32>
      %c0_62 = arith.constant 0 : index
      %c0_63 = arith.constant 0 : index
      %c0_64 = arith.constant 0 : index
      %91 = vector.load %arg11[%c0_62, %c0_63, %c0_64] : memref<2x8x1xf32, #tpu.memory_space<vmem>>, vector<2x8x1xf32>
      tpu.vector_store %arg11[%c0_62, %c0_63, %c0_64], %90 {strides = array<i32>} : memref<2x8x1xf32, #tpu.memory_space<vmem>>, vector<2x8x1xf32>,
      %cst_65 = arith.constant 0.000000e+00 : f32
      %92 = vector.broadcast %cst_65 : f32 to vector<2x8x16xf32>
      %c0_66 = arith.constant 0 : index
      %c0_67 = arith.constant 0 : index
      %c0_68 = arith.constant 0 : index
      %93 = vector.load %arg12[%c0_66, %c0_67, %c0_68] : memref<2x8x16xf32, #tpu.memory_space<vmem>>, vector<2x8x16xf32>
      tpu.vector_store %arg12[%c0_66, %c0_67, %c0_68], %92 {strides = array<i32>} : memref<2x8x16xf32, #tpu.memory_space<vmem>>, vector<2x8x16xf32>,
    } else {
    }
    %c0 = arith.constant 0 : index
    %c0_1 = arith.constant 0 : index
    %c0_2 = arith.constant 0 : index
    %3 = vector.load %arg3[%c0, %c0_1, %c0_2] : memref<1x8x32xf32, #tpu.memory_space<vmem>>, vector<1x8x32xf32>
    %4 = vector.shape_cast %3 : vector<1x8x32xf32> to vector<8x32xf32>
    %c0_3 = arith.constant 0 : index
    %c0_4 = arith.constant 0 : index
    %c0_5 = arith.constant 0 : index
    %5 = vector.load %arg4[%c0_3, %c0_4, %c0_5] : memref<1x8x32xf32, #tpu.memory_space<vmem>>, vector<1x8x32xf32>
    %6 = vector.shape_cast %5 : vector<1x8x32xf32> to vector<8x32xf32>
    %c0_6 = arith.constant 0 : index
    %c0_7 = arith.constant 0 : index
    %7 = vector.load %arg5[%c0_6, %c0_7] : memref<32x32xf32, #tpu.memory_space<vmem>>, vector<32x32xf32>
    %cst = arith.constant dense<0.000000e+00> : vector<8x32xf32>
    %8 = tpu.matmul %4, %7, %cst {dimension_numbers = #tpu.dot_dimension_numbers<[1], [0], [0], [1], [0, 0, 1, 1], [], []>} : vector<8x32xf32>, vector<32x32xf32>, vector<8x32xf32> -> vector<8x32xf32>
    %cst_8 = arith.constant 2.500000e-01 : f32
    %9 = vector.broadcast %cst_8 : f32 to vector<8x32xf32>
    %10 = arith.mulf %8, %9 : vector<8x32xf32>
    %c0_9 = arith.constant 0 : index
    %c0_10 = arith.constant 0 : index
    %11 = vector.load %arg6[%c0_9, %c0_10] : memref<32x64xf32, #tpu.memory_space<vmem>>, vector<32x64xf32>
    %cst_11 = arith.constant dense<0.000000e+00> : vector<8x64xf32>
    %12 = tpu.matmul %6, %11, %cst_11 {dimension_numbers = #tpu.dot_dimension_numbers<[1], [0], [0], [1], [0, 0, 1, 1], [], []>} : vector<8x32xf32>, vector<32x64xf32>, vector<8x64xf32> -> vector<8x64xf32>
    %13 = vector.extract_strided_slice %12 {offsets = [0, 0], sizes = [8, 32], strides = [1, 1]} : vector<8x64xf32> to vector<8x32xf32>
    %14 = vector.extract_strided_slice %12 {offsets = [0, 32], sizes = [8, 32], strides = [1, 1]} : vector<8x64xf32> to vector<8x32xf32>
    %15 = vector.extract_strided_slice %10 {offsets = [0, 0], sizes = [8, 16], strides = [1, 1]} : vector<8x32xf32> to vector<8x16xf32>
    %16 = vector.extract_strided_slice %13 {offsets = [0, 0], sizes = [8, 16], strides = [1, 1]} : vector<8x32xf32> to vector<8x16xf32>
    %17 = vector.extract_strided_slice %14 {offsets = [0, 0], sizes = [8, 16], strides = [1, 1]} : vector<8x32xf32> to vector<8x16xf32>
    %cst_12 = arith.constant dense<0.000000e+00> : vector<8x8xf32>
    %18 = tpu.matmul %15, %16, %cst_12 {dimension_numbers = #tpu.dot_dimension_numbers<[1], [1], [0], [0], [0, 0, 1, 0], [], []>} : vector<8x16xf32>, vector<8x16xf32>, vector<8x8xf32> -> vector<8x8xf32>
    %c0_13 = arith.constant 0 : index
    %c0_14 = arith.constant 0 : index
    %c0_15 = arith.constant 0 : index
    %19 = vector.load %arg10[%c0_13, %c0_14, %c0_15] : memref<2x8x1xf32, #tpu.memory_space<vmem>>, vector<1x8x1xf32>
    %20 = vector.shape_cast %19 : vector<1x8x1xf32> to vector<8x1xf32>
    %cst_16 = arith.constant dense<0xFF800000> : vector<8xf32>
    %21 = vector.multi_reduction <maximumf>, %18, %cst_16 [1] : vector<8x8xf32> to vector<8xf32>
    %22 = vector.shape_cast %21 : vector<8xf32> to vector<8x1xf32>
    %23 = arith.maximumf %20, %22 : vector<8x1xf32>
    %24 = arith.subf %20, %23 : vector<8x1xf32>
    %25 = math.exp %24 : vector<8x1xf32>
    %26 = vector.broadcast %23 : vector<8x1xf32> to vector<8x8xf32>
    %27 = arith.subf %18, %26 : vector<8x8xf32>
    %28 = math.exp %27 : vector<8x8xf32>
    %c0_17 = arith.constant 0 : index
    %c0_18 = arith.constant 0 : index
    %c0_19 = arith.constant 0 : index
    %29 = vector.load %arg11[%c0_17, %c0_18, %c0_19] : memref<2x8x1xf32, #tpu.memory_space<vmem>>, vector<1x8x1xf32>
    %30 = vector.shape_cast %29 : vector<1x8x1xf32> to vector<8x1xf32>
    %31 = arith.mulf %25, %30 : vector<8x1xf32>
    %cst_20 = arith.constant dense<0.000000e+00> : vector<8xf32>
    %32 = vector.multi_reduction <add>, %28, %cst_20 [1] : vector<8x8xf32> to vector<8xf32>
    %33 = vector.shape_cast %32 : vector<8xf32> to vector<8x1xf32>
    %34 = arith.addf %31, %33 : vector<8x1xf32>
    %c0_21 = arith.constant 0 : index
    %c0_22 = arith.constant 0 : index
    %c0_23 = arith.constant 0 : index
    %35 = vector.load %arg11[%c0_21, %c0_22, %c0_23] : memref<2x8x1xf32, #tpu.memory_space<vmem>>, vector<1x8x1xf32>
    %36 = vector.shape_cast %35 : vector<1x8x1xf32> to vector<8x1xf32>
    %37 = vector.shape_cast %34 : vector<8x1xf32> to vector<1x8x1xf32>
    tpu.vector_store %arg11[%c0_21, %c0_22, %c0_23], %37 {strides = array<i32>} : memref<2x8x1xf32, #tpu.memory_space<vmem>>, vector<1x8x1xf32>,
    %c0_24 = arith.constant 0 : index
    %c0_25 = arith.constant 0 : index
    %c0_26 = arith.constant 0 : index
    %38 = vector.load %arg12[%c0_24, %c0_25, %c0_26] : memref<2x8x16xf32, #tpu.memory_space<vmem>>, vector<1x8x16xf32>
    %39 = vector.shape_cast %38 : vector<1x8x16xf32> to vector<8x16xf32>
    %40 = vector.broadcast %25 : vector<8x1xf32> to vector<8x16xf32>
    %41 = arith.mulf %40, %39 : vector<8x16xf32>
    %cst_27 = arith.constant dense<0.000000e+00> : vector<8x16xf32>
    %42 = tpu.matmul %28, %17, %cst_27 {dimension_numbers = #tpu.dot_dimension_numbers<[1], [0], [0], [1], [0, 0, 1, 1], [], []>} : vector<8x8xf32>, vector<8x16xf32>, vector<8x16xf32> -> vector<8x16xf32>
    %43 = arith.addf %41, %42 : vector<8x16xf32>
    %c0_28 = arith.constant 0 : index
    %c0_29 = arith.constant 0 : index
    %c0_30 = arith.constant 0 : index
    %44 = vector.load %arg12[%c0_28, %c0_29, %c0_30] : memref<2x8x16xf32, #tpu.memory_space<vmem>>, vector<1x8x16xf32>
    %45 = vector.shape_cast %44 : vector<1x8x16xf32> to vector<8x16xf32>
    %46 = vector.shape_cast %43 : vector<8x16xf32> to vector<1x8x16xf32>
    tpu.vector_store %arg12[%c0_28, %c0_29, %c0_30], %46 {strides = array<i32>} : memref<2x8x16xf32, #tpu.memory_space<vmem>>, vector<1x8x16xf32>,
    %c0_31 = arith.constant 0 : index
    %c0_32 = arith.constant 0 : index
    %c0_33 = arith.constant 0 : index
    %47 = vector.load %arg10[%c0_31, %c0_32, %c0_33] : memref<2x8x1xf32, #tpu.memory_space<vmem>>, vector<1x8x1xf32>
    %48 = vector.shape_cast %47 : vector<1x8x1xf32> to vector<8x1xf32>
    %49 = vector.shape_cast %23 : vector<8x1xf32> to vector<1x8x1xf32>
    tpu.vector_store %arg10[%c0_31, %c0_32, %c0_33], %49 {strides = array<i32>} : memref<2x8x1xf32, #tpu.memory_space<vmem>>, vector<1x8x1xf32>,
    %50 = vector.extract_strided_slice %10 {offsets = [0, 16], sizes = [8, 16], strides = [1, 1]} : vector<8x32xf32> to vector<8x16xf32>
    %51 = vector.extract_strided_slice %13 {offsets = [0, 16], sizes = [8, 16], strides = [1, 1]} : vector<8x32xf32> to vector<8x16xf32>
    %52 = vector.extract_strided_slice %14 {offsets = [0, 16], sizes = [8, 16], strides = [1, 1]} : vector<8x32xf32> to vector<8x16xf32>
    %cst_34 = arith.constant dense<0.000000e+00> : vector<8x8xf32>
    %53 = tpu.matmul %50, %51, %cst_34 {dimension_numbers = #tpu.dot_dimension_numbers<[1], [1], [0], [0], [0, 0, 1, 0], [], []>} : vector<8x16xf32>, vector<8x16xf32>, vector<8x8xf32> -> vector<8x8xf32>
    %c1 = arith.constant 1 : index
    %c0_35 = arith.constant 0 : index
    %c0_36 = arith.constant 0 : index
    %54 = vector.load %arg10[%c1, %c0_35, %c0_36] : memref<2x8x1xf32, #tpu.memory_space<vmem>>, vector<1x8x1xf32>
    %55 = vector.shape_cast %54 : vector<1x8x1xf32> to vector<8x1xf32>
    %cst_37 = arith.constant dense<0xFF800000> : vector<8xf32>
    %56 = vector.multi_reduction <maximumf>, %53, %cst_37 [1] : vector<8x8xf32> to vector<8xf32>
    %57 = vector.shape_cast %56 : vector<8xf32> to vector<8x1xf32>
    %58 = arith.maximumf %55, %57 : vector<8x1xf32>
    %59 = arith.subf %55, %58 : vector<8x1xf32>
    %60 = math.exp %59 : vector<8x1xf32>
    %61 = vector.broadcast %58 : vector<8x1xf32> to vector<8x8xf32>
    %62 = arith.subf %53, %61 : vector<8x8xf32>
    %63 = math.exp %62 : vector<8x8xf32>
    %c1_38 = arith.constant 1 : index
    %c0_39 = arith.constant 0 : index
    %c0_40 = arith.constant 0 : index
    %64 = vector.load %arg11[%c1_38, %c0_39, %c0_40] : memref<2x8x1xf32, #tpu.memory_space<vmem>>, vector<1x8x1xf32>
    %65 = vector.shape_cast %64 : vector<1x8x1xf32> to vector<8x1xf32>
    %66 = arith.mulf %60, %65 : vector<8x1xf32>
    %cst_41 = arith.constant dense<0.000000e+00> : vector<8xf32>
    %67 = vector.multi_reduction <add>, %63, %cst_41 [1] : vector<8x8xf32> to vector<8xf32>
    %68 = vector.shape_cast %67 : vector<8xf32> to vector<8x1xf32>
    %69 = arith.addf %66, %68 : vector<8x1xf32>
    %c1_42 = arith.constant 1 : index
    %c0_43 = arith.constant 0 : index
    %c0_44 = arith.constant 0 : index
    %70 = vector.load %arg11[%c1_42, %c0_43, %c0_44] : memref<2x8x1xf32, #tpu.memory_space<vmem>>, vector<1x8x1xf32>
    %71 = vector.shape_cast %70 : vector<1x8x1xf32> to vector<8x1xf32>
    %72 = vector.shape_cast %69 : vector<8x1xf32> to vector<1x8x1xf32>
    tpu.vector_store %arg11[%c1_42, %c0_43, %c0_44], %72 {strides = array<i32>} : memref<2x8x1xf32, #tpu.memory_space<vmem>>, vector<1x8x1xf32>,
    %c1_45 = arith.constant 1 : index
    %c0_46 = arith.constant 0 : index
    %c0_47 = arith.constant 0 : index
    %73 = vector.load %arg12[%c1_45, %c0_46, %c0_47] : memref<2x8x16xf32, #tpu.memory_space<vmem>>, vector<1x8x16xf32>
    %74 = vector.shape_cast %73 : vector<1x8x16xf32> to vector<8x16xf32>
    %75 = vector.broadcast %60 : vector<8x1xf32> to vector<8x16xf32>
    %76 = arith.mulf %75, %74 : vector<8x16xf32>
    %cst_48 = arith.constant dense<0.000000e+00> : vector<8x16xf32>
    %77 = tpu.matmul %63, %52, %cst_48 {dimension_numbers = #tpu.dot_dimension_numbers<[1], [0], [0], [1], [0, 0, 1, 1], [], []>} : vector<8x8xf32>, vector<8x16xf32>, vector<8x16xf32> -> vector<8x16xf32>
    %78 = arith.addf %76, %77 : vector<8x16xf32>
    %c1_49 = arith.constant 1 : index
    %c0_50 = arith.constant 0 : index
    %c0_51 = arith.constant 0 : index
    %79 = vector.load %arg12[%c1_49, %c0_50, %c0_51] : memref<2x8x16xf32, #tpu.memory_space<vmem>>, vector<1x8x16xf32>
    %80 = vector.shape_cast %79 : vector<1x8x16xf32> to vector<8x16xf32>
    %81 = vector.shape_cast %78 : vector<8x16xf32> to vector<1x8x16xf32>
    tpu.vector_store %arg12[%c1_49, %c0_50, %c0_51], %81 {strides = array<i32>} : memref<2x8x16xf32, #tpu.memory_space<vmem>>, vector<1x8x16xf32>,
    %c1_52 = arith.constant 1 : index
    %c0_53 = arith.constant 0 : index
    %c0_54 = arith.constant 0 : index
    %82 = vector.load %arg10[%c1_52, %c0_53, %c0_54] : memref<2x8x1xf32, #tpu.memory_space<vmem>>, vector<1x8x1xf32>
    %83 = vector.shape_cast %82 : vector<1x8x1xf32> to vector<8x1xf32>
    %84 = vector.shape_cast %58 : vector<8x1xf32> to vector<1x8x1xf32>
    tpu.vector_store %arg10[%c1_52, %c0_53, %c0_54], %84 {strides = array<i32>} : memref<2x8x1xf32, #tpu.memory_space<vmem>>, vector<1x8x1xf32>,
    %c0_i32_55 = arith.constant 0 : i32
    %85 = arith.cmpi eq, %arg2, %c0_i32_55 : i32
    %86 = arith.extui %85 : i1 to i32
    %c0_i32_56 = arith.constant 0 : i32
    %87 = arith.cmpi ne, %86, %c0_i32_56 : i32
    scf.if %87 {
      %c0_57 = arith.constant 0 : index
      %c0_58 = arith.constant 0 : index
      %88 = vector.load %arg7[%c0_57, %c0_58] : memref<32x32xf32, #tpu.memory_space<vmem>>, vector<32x32xf32>
      %c0_59 = arith.constant 0 : index
      %c0_60 = arith.constant 0 : index
      %89 = vector.load %arg8[%c0_59, %c0_60] : memref<1x32xf32, #tpu.memory_space<vmem>>, vector<1x32xf32>
      %90 = vector.shape_cast %89 : vector<1x32xf32> to vector<1x32xf32>
      %91 = vector.broadcast %90 : vector<1x32xf32> to vector<8x32xf32>
      %c0_61 = arith.constant 0 : index
      %c0_62 = arith.constant 0 : index
      %c0_63 = arith.constant 0 : index
      %92 = vector.load %arg11[%c0_61, %c0_62, %c0_63] : memref<2x8x1xf32, #tpu.memory_space<vmem>>, vector<1x8x1xf32>
      %93 = vector.shape_cast %92 : vector<1x8x1xf32> to vector<8x1xf32>
      %94 = tpu.reciprocal %93 {approx = true} : vector<8x1xf32> -> vector<8x1xf32>
      %c0_64 = arith.constant 0 : index
      %c0_65 = arith.constant 0 : index
      %c0_66 = arith.constant 0 : index
      %95 = vector.load %arg12[%c0_64, %c0_65, %c0_66] : memref<2x8x16xf32, #tpu.memory_space<vmem>>, vector<1x8x16xf32>
      %96 = vector.shape_cast %95 : vector<1x8x16xf32> to vector<8x16xf32>
      %97 = vector.broadcast %94 : vector<8x1xf32> to vector<8x16xf32>
      %98 = arith.mulf %96, %97 : vector<8x16xf32>
      %99 = vector.extract_strided_slice %88 {offsets = [0, 0], sizes = [16, 32], strides = [1, 1]} : vector<32x32xf32> to vector<16x32xf32>
      %cst_67 = arith.constant dense<0.000000e+00> : vector<8x32xf32>
      %100 = tpu.matmul %98, %99, %cst_67 {dimension_numbers = #tpu.dot_dimension_numbers<[1], [0], [0], [1], [0, 0, 1, 1], [], []>} : vector<8x16xf32>, vector<16x32xf32>, vector<8x32xf32> -> vector<8x32xf32>
      %101 = arith.addf %91, %100 : vector<8x32xf32>
      %c1_68 = arith.constant 1 : index
      %c0_69 = arith.constant 0 : index
      %c0_70 = arith.constant 0 : index
      %102 = vector.load %arg11[%c1_68, %c0_69, %c0_70] : memref<2x8x1xf32, #tpu.memory_space<vmem>>, vector<1x8x1xf32>
      %103 = vector.shape_cast %102 : vector<1x8x1xf32> to vector<8x1xf32>
      %104 = tpu.reciprocal %103 {approx = true} : vector<8x1xf32> -> vector<8x1xf32>
      %c1_71 = arith.constant 1 : index
      %c0_72 = arith.constant 0 : index
      %c0_73 = arith.constant 0 : index
      %105 = vector.load %arg12[%c1_71, %c0_72, %c0_73] : memref<2x8x16xf32, #tpu.memory_space<vmem>>, vector<1x8x16xf32>
      %106 = vector.shape_cast %105 : vector<1x8x16xf32> to vector<8x16xf32>
      %107 = vector.broadcast %104 : vector<8x1xf32> to vector<8x16xf32>
      %108 = arith.mulf %106, %107 : vector<8x16xf32>
      %109 = vector.extract_strided_slice %88 {offsets = [16, 0], sizes = [16, 32], strides = [1, 1]} : vector<32x32xf32> to vector<16x32xf32>
      %cst_74 = arith.constant dense<0.000000e+00> : vector<8x32xf32>
      %110 = tpu.matmul %108, %109, %cst_74 {dimension_numbers = #tpu.dot_dimension_numbers<[1], [0], [0], [1], [0, 0, 1, 1], [], []>} : vector<8x16xf32>, vector<16x32xf32>, vector<8x32xf32> -> vector<8x32xf32>
      %111 = arith.addf %101, %110 : vector<8x32xf32>
      %c0_75 = arith.constant 0 : index
      %c0_76 = arith.constant 0 : index
      %c0_77 = arith.constant 0 : index
      %112 = vector.load %arg9[%c0_75, %c0_76, %c0_77] : memref<1x8x32xf32, #tpu.memory_space<vmem>>, vector<1x8x32xf32>
      %113 = vector.shape_cast %112 : vector<1x8x32xf32> to vector<8x32xf32>
      %114 = vector.shape_cast %111 : vector<8x32xf32> to vector<1x8x32xf32>
      tpu.vector_store %arg9[%c0_75, %c0_76, %c0_77], %114 {strides = array<i32>} : memref<1x8x32xf32, #tpu.memory_space<vmem>>, vector<1x8x32xf32>,
    } else {
    }
    return
  }
  func.func @transform_0(%arg0: i32, %arg1: i32, %arg2: i32) -> (i32, i32, i32) {
    %c0_i32 = arith.constant 0 : i32
    %c0_i32_0 = arith.constant 0 : i32
    return %arg0, %arg1, %c0_i32 : i32, i32, i32
  }
  func.func @transform_1(%arg0: i32, %arg1: i32, %arg2: i32) -> (i32, i32, i32) {
    %c0_i32 = arith.constant 0 : i32
    %c0_i32_0 = arith.constant 0 : i32
    return %arg0, %arg2, %c0_i32 : i32, i32, i32
  }
  func.func @transform_2(%arg0: i32, %arg1: i32, %arg2: i32) -> (i32, i32) {
    %c0_i32 = arith.constant 0 : i32
    %c0_i32_0 = arith.constant 0 : i32
    %c0_i32_1 = arith.constant 0 : i32
    return %c0_i32, %c0_i32_0 : i32, i32
  }
  func.func @transform_3(%arg0: i32, %arg1: i32, %arg2: i32) -> (i32, i32) {
    %c0_i32 = arith.constant 0 : i32
    %c0_i32_0 = arith.constant 0 : i32
    %c0_i32_1 = arith.constant 0 : i32
    return %c0_i32, %c0_i32_0 : i32, i32
  }
  func.func @transform_4(%arg0: i32, %arg1: i32, %arg2: i32) -> (i32, i32) {
    %c0_i32 = arith.constant 0 : i32
    %c0_i32_0 = arith.constant 0 : i32
    %c0_i32_1 = arith.constant 0 : i32
    return %c0_i32, %c0_i32_0 : i32, i32
  }
  func.func @transform_5(%arg0: i32, %arg1: i32, %arg2: i32) -> (i32, i32) {
    %c0_i32 = arith.constant 0 : i32
    %c0_i32_0 = arith.constant 0 : i32
    %c0_i32_1 = arith.constant 0 : i32
    return %c0_i32, %c0_i32_0 : i32, i32
  }
  func.func @transform_6(%arg0: i32, %arg1: i32, %arg2: i32) -> (i32, i32, i32) {
    %c0_i32 = arith.constant 0 : i32
    %c0_i32_0 = arith.constant 0 : i32
    return %arg0, %arg1, %c0_i32 : i32, i32, i32
  }
}

</mosaic_0001>

<bundles_post_ra>
// kernel: tpu_custom_call.1
= control target key start
LH: loop header
LB: loop body
LE: loop exit
PB: predicated region body
PF: predicated region fallthrough
CT: control target
= control target key end

     0   :  { %s2185_s0 = inlined_call_operand.hbm [shape: f32[2,8,32], index: 0, kind: input, shape index: {}]   ;;  %s2186_s1 = inlined_call_operand.hbm [shape: f32[2,8,32], index: 1, kind: input, shape index: {}]   ;;  %s2187_s2 = inlined_call_operand.hbm [shape: f32[32,32], index: 2, kind: input, shape index: {}]   ;;  %s2188_s3 = inlined_call_operand.hbm [shape: f32[32,64], index: 3, kind: input, shape index: {}]   ;;  %s2189_s4 = inlined_call_operand.hbm [shape: f32[32,32], index: 4, kind: input, shape index: {}]   ;;  %s2190_s5 = inlined_call_operand.vmem [shape: f32[1,32], index: 5, kind: input, shape index: {}]   ;;  %s2191_s6 = inlined_call_operand.hbm [shape: f32[2,8,32], index: 6, kind: output, shape index: {}]  }
   0x1   :  { %2198 = sst [smem:[#allocation22_spill]] %s2187_s2 }
   0x2   :  { %2199 = sst [smem:[#allocation23_spill]] %s2188_s3 }
   0x3   :  { %2200 = sst [smem:[#allocation24_spill]] %s2189_s4 }
   0x4   :  { %11 = vsyncpa [#allocation6], 0 }
   0x5   :  { %13 = vsyncpa [#allocation6 + $0x1], 0 }
   0x6   :  { %14 = vsyncpa [#allocation9], 0 }
   0x7   :  { %16 = vsyncpa [#allocation9 + $0x1], 0 }
   0x8   :  { %17 = vsyncpa [#allocation12], 0 }
   0x9   :  { %18 = vsyncpa [#allocation7], 0 }
   0xa   :  { %20 = vsyncpa [#allocation7 + $0x1], 0  ;;  %s1800_s21 = smov 0   ;;  %s1802_s22 = smov 0  }
   0xb   :  { %s1804_s23 = smov 0   ;;  %s1806_s24 = smov 0  }
   0xc   :  { %s1808_s25 = smov 0   ;;  %s1810_s26 = smov 0  }
   0xd LB: > { %2201 = sst [smem:[#allocation20_spill]] %s1727_s21  ;;  %s1831_s27 = sadd.s32 4294967295, %s1747_s26   ;;  %s1747_s26 = sphi %s1810_s26, %s26_s26   ;;  %s1743_s25 = sphi %s1808_s25, %s2229_s25   ;;  %s1739_s24 = sphi %s1806_s24, %s2228_s24   ;;  %s1735_s23 = sphi %s1804_s23, %s2227_s23   ;;  %s1731_s22 = sphi %s1802_s22, %s2226_s22   ;;  %s1727_s21 = sphi %s1800_s21, %s2225_s21  }
   0xe   : > { %s1254_s28 = sadd.s32 4294967294, %s1747_s26   ;;  %p67_p0 = scmp.ne.s32.totalorder %s1731_s22, %s1727_s21 }
   0xf   : > { %p2192_p1 = scmp.eq.s32.totalorder %s1831_s27, 0  ;;  %p211_p3 = scmp.eq.s32.totalorder %s1254_s28, 1 }
  0x10   : > { %p1255_p5 = scmp.ge.s32.totalorder %s1747_s26, 1  ;;  %p218_p7 = scmp.lt.s32.totalorder %s1747_s26, 3 }
  0x11   : > { %p1840_p4 = por %p2192_p1, %p67_p0  ;;  %p1845_p6 = por %p211_p3, %p67_p0 }
  0x12   : > { %p1850_p8 = pnand %p1255_p5, %p218_p7  ;;  %s1749_s8 = smov [#allocation10]  }
  0x13   : > { %s2202_s29 = scalar_select %p1840_p4, 1, 0 }
  0x14   : > { %s2203_s30 = scalar_select %p1845_p6, 1, 0 }
  0x15   : > { %s2205_s7 = scalar_select %p1850_p8, 1, 0 }
  0x16   : > { %2204 = sst [smem:[#allocation21_spill]] %s2203_s30  ;;  %s230_s9 = sshll.u32 %s1749_s8, 4  ;;  %s1854_s9 = int_to_ptr.vmem [resolvable:$true] %s230_s9 }
  0x17   : > { %p1405_p9 = pneg %p1850_p8  ;;  %s1750_s11 = smov [#allocation11]  }
  0x18   : > { %s243_s12 = sshll.u32 %s1750_s11, 4  ;;  %s1751_s13 = smov [#allocation13]   ;;  %s1865_s12 = int_to_ptr.vmem [resolvable:$true] %s243_s12 }
  0x19   : > { %p1861_p11 = pnand %p1405_p9, %p2192_p1  ;;  %s1867_s14 = sshll.u32 %s1751_s13, 4  ;;  %s257_s14 = int_to_ptr.vmem [resolvable:$true] %s1867_s14 }
  0x1a   : > { %s2207_s2 = sld [smem:[#allocation22_spill]] }
  0x1b   : > { %p1877_p13 = pneg %p1861_p11 }
  0x20   : > { %s1509_s17 = scalar_lea.hbm %s2207_s2, 512 }
  0x21   : > { %p1510_p12 = scmp.ne.s32.totalorder %s2207_s2, %s1509_s17  ;;  %p1516_p5 = scmp.lt.u32.totalorder %s1509_s17, %s2207_s2 }
  0x23   : > { %p1512_p0 = pnand %p1877_p13, %p1510_p12 }
  0x25   : > { %p1513_p3 = pneg %p1512_p0 }
  0x27   : > { %p1518_p7 = pnand %p1516_p5, %p1513_p3 }
  0x29   : > { %1521 = shalt.err (!%p1518_p7)
}
  0x2a   : > { %s1522_s11 = scalar_lea.vmem %s1854_s9, 512  ;;  %p1530_p2 = scmp.lt.s32.totalorder %s1854_s9, %s1854_s9 }
  0x2b   : > { %p1523_p9 = scmp.ne.s32.totalorder %s1854_s9, %s1522_s11  ;;  %p1531_p6 = scmp.lt.s32.totalorder %s1522_s11, %s1522_s11 }
  0x2d   : > { %p1525_p10 = pnand %p1523_p9, %p1877_p13  ;;  %p1532_p12 = por %p1531_p6, %p1530_p2 }
  0x2f   : > { %p1526_p1 = pneg %p1525_p10 }
  0x31   : > { %p1533_p0 = pnand %p1532_p12, %p1526_p1 }
  0x33   : > { %1536 = shalt.err (!%p1533_p0)
}
  0x34   : > { %s1752_s13 = smov 128   ;;  %s1753_s15 = smov 8  }
  0x35   : > { %1408 = dma.hbm_to_vmem [thread:$0]  (!%p1861_p11), %s2207_s2, 512, %s1854_s9, [#allocation9], %s1752_s13, %s1752_s13, %s1753_s15  }
  0x36   : > { %s2209_s3 = sld [smem:[#allocation23_spill]] }
  0x3c   : > { %s1537_s28 = scalar_lea.hbm %s2209_s3, 512 }
  0x3d   : > { %p1538_p1 = scmp.ne.s32.totalorder %s2209_s3, %s1537_s28  ;;  %p1544_p10 = scmp.lt.u32.totalorder %s1537_s28, %s2209_s3 }
  0x3f   : > { %p1540_p2 = pnand %p1538_p1, %p1877_p13 }
  0x41   : > { %p1541_p6 = pneg %p1540_p2 }
  0x43   : > { %p1546_p3 = pnand %p1544_p10, %p1541_p6 }
  0x45   : > { %1549 = shalt.err (!%p1546_p3)
}
  0x46   : > { %s1550_s9 = scalar_lea.vmem %s1865_s12, 512  ;;  %p1558_p12 = scmp.lt.s32.totalorder %s1865_s12, %s1865_s12 }
  0x47   : > { %p1551_p5 = scmp.ne.s32.totalorder %s1865_s12, %s1550_s9  ;;  %p1559_p0 = scmp.lt.s32.totalorder %s1550_s9, %s1550_s9 }
  0x49   : > { %p1553_p7 = pnand %p1551_p5, %p1877_p13  ;;  %p1560_p1 = por %p1559_p0, %p1558_p12 }
  0x4b   : > { %p1554_p9 = pneg %p1553_p7 }
  0x4d   : > { %p1561_p2 = pnand %p1560_p1, %p1554_p9 }
  0x4f   : > { %1564 = shalt.err (!%p1561_p2)
}
  0x50   : > { %1411 = dma.hbm_to_vmem [thread:$0]  (!%p1861_p11), %s2209_s3, 512, %s1865_s12, [#allocation12], %s1752_s13, %s1752_s13, %s1753_s15  }
  0x51   : > { %s2210_s4 = sld [smem:[#allocation24_spill]] }
  0x57   : > { %s1565_s18 = scalar_lea.hbm %s2210_s4, 512 }
  0x58   : > { %p1566_p6 = scmp.ne.s32.totalorder %s2210_s4, %s1565_s18  ;;  %p1572_p5 = scmp.lt.u32.totalorder %s1565_s18, %s2210_s4 }
  0x5a   : > { %p1568_p10 = pnand %p1566_p6, %p1877_p13 }
  0x5c   : > { %p1569_p3 = pneg %p1568_p10 }
  0x5e   : > { %p1574_p7 = pnand %p1572_p5, %p1569_p3 }
  0x60   : > { %1577 = shalt.err (!%p1574_p7)
}
  0x61   : > { %s1578_s9 = scalar_lea.vmem %s257_s14, 512  ;;  %p1586_p1 = scmp.lt.s32.totalorder %s257_s14, %s257_s14 }
  0x62   : > { %p1579_p9 = scmp.ne.s32.totalorder %s257_s14, %s1578_s9  ;;  %p1587_p2 = scmp.lt.s32.totalorder %s1578_s9, %s1578_s9 }
  0x64   : > { %p1581_p12 = pnand %p1579_p9, %p1877_p13  ;;  %p1588_p4 = por %p1587_p2, %p1586_p1 }
  0x66   : > { %p1582_p0 = pneg %p1581_p12 }
  0x68   : > { %p1589_p8 = pnand %p1588_p4, %p1582_p0 }
  0x6a   : > { %1592 = shalt.err (!%p1589_p8)
}
  0x6b   : > { %1414 = dma.hbm_to_vmem [thread:$0]  (!%p1861_p11), %s2210_s4, 512, %s257_s14, [#allocation12], %s1752_s13, %s1752_s13, %s1753_s15  }
  0x6c   : > { %s54_s20 = sadd.s32 1, %s1735_s23  ;;  %s45_s10 = sadd.s32 1, %s1743_s25 }
  0x6d   : > { %p61_p4 = scmp.ne.s32.totalorder %s1735_s23, %s1731_s22  ;;  %p47_p8 = scmp.ge.s32.totalorder %s45_s10, 2 }
  0x6e   : > { %p62_p13 = scmp.eq.s32.totalorder %s1747_s26, 0  ;;  %p2211_p6 = scmp.eq.s32.totalorder %s1831_s27, 1 }
  0x6f   : > { %p1429_p3 = scmp.lt.s32.totalorder %s1747_s26, 2  ;;  %s2231_s10 = smov (%p47_p8, %s45_s10), 0 }
  0x70   : > { %p1956_p10 = por %p2211_p6, %p61_p4  ;;  %p63_p5 = por %p62_p13, %p61_p4 }
  0x71   : > { %s273_s16 = sand.u32 1, %s1735_s23   ;;  %s49_s17 = ssub.s32 %s1743_s25, %s2231_s10 }
  0x72   : > { %s2212_s30 = scalar_select %p1956_p10, 1, 0 }
  0x73   : > { %p52_p11 = scmp.eq.s32.totalorder %s49_s17, 0  ;;  %s1966_s14 = sshll.u32 %s273_s16, 3 }
  0x74   : > { %s1261_s13 = sshll.u32 %s1743_s25, 7  ;;  %s277_s8 = scalar_lea.vmem [#allocation5], %s1966_s14 }
  0x75   : > { %s1970_s15 = scalar_select %p52_p11, %s1735_s23, %s54_s20  }
  0x76   : > { %s1975_s28 = scalar_lea.hbm %s2185_s0, %s1261_s13  ;;  %s285_s11 = sshll.u32 %s277_s8, 4  ;;  %s1978_s11 = int_to_ptr.vmem [resolvable:$true] %s285_s11 }
  0x77   : > { %p1982_p7 = pnand %p1429_p3, %p63_p5  ;;  %s1989_s20 = scalar_lea.hbm %s2186_s1, %s1261_s13 }
  0x78   : > { %s292_s17 = sand.u32 1, %s1747_s26   ;;  %s274_s18 = scalar_lea.sflag [#allocation6], %s273_s16 }
  0x79   : > { %s1593_s19 = scalar_lea.hbm %s1975_s28, 128  ;;  %p1595_p12 = pneg %p1982_p7 }
  0x7a   : > { %p1594_p9 = scmp.ne.s32.totalorder %s1975_s28, %s1593_s19  ;;  %s1598_s3 = scalar_lea.hbm %s2185_s0, 256 }
  0x7b   : > { %p1599_p2 = scmp.lt.u32.totalorder %s1975_s28, %s2185_s0  ;;  %p1600_p4 = scmp.lt.u32.totalorder %s1598_s3, %s1593_s19 }
  0x7c   : > { %p1596_p0 = pnand %p1595_p12, %p1594_p9  ;;  %p1602_p13 = scmp.lt.u32.totalorder %s1593_s19, %s1975_s28 }
  0x7d   : > { %p1601_p8 = por %p1600_p4, %p1599_p2 }
  0x7e   : > { %p1597_p1 = pneg %p1596_p0 }
  0x7f   : > { %p1603_p6 = por %p1602_p13, %p1601_p8 }
  0x81   : > { %p1604_p3 = pnand %p1603_p6, %p1597_p1 }
  0x83   : > { %1607 = shalt.err (!%p1604_p3)
}
  0x84   : > { %s1608_s16 = scalar_lea.vmem %s1978_s11, 128  ;;  %s1754_s2 = smov [#allocation5]  }
  0x85   : > { %p1609_p5 = scmp.ne.s32.totalorder %s1978_s11, %s1608_s16  ;;  %s1613_s13 = sshll.u32 %s1754_s2, 4  ;;  %s1614_s13 = int_to_ptr.vmem [resolvable:$false] %s1613_s13 }
  0x86   : > { %s1615_s4 = scalar_lea.vmem %s1614_s13, 256  ;;  %p1616_p0 = scmp.lt.s32.totalorder %s1978_s11, %s1614_s13 }
  0x87   : > { %p1611_p11 = pnand %p1609_p5, %p1595_p12  ;;  %p1617_p2 = scmp.lt.s32.totalorder %s1615_s4, %s1608_s16 }
  0x89   : > { %p1612_p9 = pneg %p1611_p11  ;;  %p1618_p4 = por %p1617_p2, %p1616_p0 }
  0x8b   : > { %p1619_p8 = pnand %p1618_p4, %p1612_p9 }
  0x8d   : > { %1622 = shalt.err (!%p1619_p8)
}
  0x8e   : > { %1418 = dma.hbm_to_vmem [thread:$0]  (!%p1982_p7), %s1975_s28, 128, %s1978_s11, %s274_s18  }
  0x8f   : > { %s296_s3 = scalar_lea.vmem [#allocation8], %s1966_s14  ;;  %s293_s19 = scalar_lea.sflag [#allocation9], %s292_s17 }
  0x90   : > { %s304_s21 = sshll.u32 %s296_s3, 4  ;;  %s1623_s8 = scalar_lea.hbm %s1989_s20, 128  ;;  %s305_s21 = int_to_ptr.vmem [resolvable:$true] %s304_s21 }
  0x91   : > { %p1624_p1 = scmp.ne.s32.totalorder %s1989_s20, %s1623_s8  ;;  %s1628_s2 = scalar_lea.hbm %s2186_s1, 256 }
  0x92   : > { %p1629_p3 = scmp.lt.u32.totalorder %s1989_s20, %s2186_s1  ;;  %p1630_p5 = scmp.lt.u32.totalorder %s1628_s2, %s1623_s8 }
  0x93   : > { %p1626_p13 = pnand %p1624_p1, %p1595_p12  ;;  %p1632_p9 = scmp.lt.u32.totalorder %s1623_s8, %s1989_s20 }
  0x94   : > { %p1631_p11 = por %p1630_p5, %p1629_p3 }
  0x95   : > { %p1627_p6 = pneg %p1626_p13 }
  0x96   : > { %p1633_p0 = por %p1632_p9, %p1631_p11 }
  0x98   : > { %p1634_p2 = pnand %p1633_p0, %p1627_p6 }
  0x9a   : > { %1637 = shalt.err (!%p1634_p2)
}
  0x9b   : > { %s1638_s14 = scalar_lea.vmem %s305_s21, 128  ;;  %s1755_s28 = smov [#allocation8]  }
  0x9c   : > { %p1639_p4 = scmp.ne.s32.totalorder %s305_s21, %s1638_s14  ;;  %s1643_s11 = sshll.u32 %s1755_s28, 4  ;;  %s1644_s11 = int_to_ptr.vmem [resolvable:$false] %s1643_s11 }
  0x9d   : > { %s1645_s17 = scalar_lea.vmem %s1644_s11, 256  ;;  %p1646_p13 = scmp.lt.s32.totalorder %s305_s21, %s1644_s11 }
  0x9e   : > { %p1641_p8 = pnand %p1639_p4, %p1595_p12  ;;  %p1647_p10 = scmp.lt.s32.totalorder %s1645_s17, %s1638_s14 }
  0xa0   : > { %p1642_p1 = pneg %p1641_p8  ;;  %p1648_p3 = por %p1647_p10, %p1646_p13 }
  0xa2   : > { %p1649_p5 = pnand %p1648_p3, %p1642_p1 }
  0xa4   : > { %1652 = shalt.err (!%p1649_p5)
}
  0xa5   : > { %1421 = dma.hbm_to_vmem [thread:$0]  (!%p1982_p7), %s1989_s20, 128, %s305_s21, %s293_s19  }
  0xa6   : > { %p2214_p6 = scmp.ne.s32.totalorder %s2205_s7, 0 }
  0xa7   : > { %s2042_s18 = sand.u32 (!%p2214_p6), 1, %s1731_s22   ;;  %p2215_p10 = scmp.ne.s32.totalorder (!%p2214_p6), %s2202_s29, 0 }
  0xa8   : > { %313 = sbr.rel (%p2214_p6) target bundleno = 1548 (0x60c), region = 44  ;;  %s2045_s3 = sshll.u32 (!%p2214_p6), %s2042_s18, 3 }
  0xa9   : > { %s316_s8 = scalar_lea.sflag (!%p2214_p6), [#allocation6], %s2042_s18  ;;  %s319_s12 = scalar_lea.vmem (!%p2214_p6), [#allocation5], %s2045_s3 }
  0xaf   : > { %1706 = dma.done.wait (%p2215_p10), %s316_s8, 128  }
  0xb0   : > { %1708 = vsyncadd (%p2215_p10), %s316_s8, 4294967168  ;;  %s324_s7 = sand.u32 1, %s1831_s27   ;;  %s328_s20 = scalar_lea.vmem [#allocation8], %s2045_s3 }
  0xb1   : > { %s325_s9 = scalar_lea.sflag [#allocation9], %s324_s7 }
  0xb2   : > { %1710 = dma.done.wait (%p2215_p10), %s325_s9, 128  }
  0xb3   : > { %1712 = vsyncadd (%p2215_p10), %s325_s9, 4294967168  ;;  %p2216_p7 = scmp.eq.s32.totalorder %s1831_s27, 0 }
  0xb5   : > { %1714 = dma.done.wait (%p2216_p7), [#allocation9], 512   ;;  %p2217_p12 = pmov %p2216_p7 }
  0xb6   : > { %p2218_p11 = pmov %p2216_p7 }
  0xb7   : > { %1716 = vsyncadd (%p2217_p12), [#allocation9], 4294966784 }
  0xb8   : > { %1718 = dma.done.wait (%p2218_p11), [#allocation12], 1024   ;;  %p2219_p9 = pmov %p2216_p7 }
  0xb9   : > { %v1756_v0 = vmov 0.0|0.0   ;;  %vm1757_vm0 = vmmov 0   ;;  %v1758_v1 = vmov 0.0   ;;  %v467_v2 = vld [vmem:[#allocation11] sm:$0xff]  ;;  %v468_v3 = vld [vmem:[#allocation11 + $0x8] sm:$0xff]  ;;  %v469_v7 = vld [vmem:[#allocation11 + $0x10] sm:$0xff] }
  0xba   : > { %1720 = vsyncadd (%p2219_p9), [#allocation12], 4294966272  ;;  %1372 = vmatprep.subr.bf16.mxu1 %v1756_v0  ;;  %1366 = vmatprep.subr.bf16.mxu0 %v1756_v0  ;;  %v388_v4 = vld [vmem:[#allocation10] sm:$0xff]  ;;  %v1373_v5 = vpack.c.bf16 %v468_v3, %v467_v2  ;;  %v389_v6 = vld [vmem:[#allocation10 + $0x8] sm:$0xff]  ;;  %vm392_vm1 = vcmask 261120   ;;  %vm383_vm2 = vcmask 130048  }
  0xbb   : > { %1329 = vmatprep.mubr.msk.f32.mxu1 %vm1757_vm0, %v1758_v1  ;;  %1318 = vmatprep.mubr.msk.f32.mxu0 %vm1757_vm0, %v1758_v1  ;;  %v470_v8 = vld [vmem:[#allocation11 + $0x18] sm:$0xff]  ;;  %v1367_v9 = vpack.c.bf16 %v389_v6, %v388_v4  ;;  %v390_v10 = vld [vmem:[#allocation10 + $0x10] sm:$0xff]  ;;  %v386_v15 = vld [vmem:[%s319_s12] sm:$0xff]  ;;  %384 = vst.msk [vmem:[#allocation4] sm:$0xff] %vm383_vm2, %v1758_v1  ;;  %s1759_s27 = smov 112   ;;  %vm378_vm3 = vcmask 7168  }
  0xbc   : > { %v391_v11 = vld [vmem:[#allocation10 + $0x18] sm:$0xff]  ;;  %1374 = vmatpush3.bf16.msra.mxu1 %v1373_v5  ;;  %v1376_v12 = vpack.c.bf16 %v470_v8, %v469_v7  ;;  %385 = vst.msk [vmem:[#allocation4 + $0x8] sm:$0xff] %vm383_vm2, %v1758_v1  ;;  %v1760_v23 = vmov -inf   ;;  %vm622_vm4 = vcmask 64512   ;;  %v1761_v27 = vmov 0   ;;  %s1762_s29 = smov 96  }
  0xbd   : > { %1368 = vmatpush3.bf16.msra.mxu0 %v1367_v9  ;;  %1375 = vmatprep.subr.bf16.mxu1 %v1756_v0  ;;  %v1370_v13 = vpack.c.bf16 %v391_v11, %v390_v10  ;;  %v387_v14 = vld [vmem:[%s328_s20] sm:$0xff]  ;;  %379 = vst.msk [vmem:[#allocation2] sm:$0xff] %vm378_vm3, %v1760_v23  ;;  %380 = vst.msk [vmem:[#allocation2 + $0x8] sm:$0xff] %vm378_vm3, %v1760_v23  ;;  %s1763_s21 = smov 80   ;;  %v925_v60 = vld [vmem:[#allocation13] sm:$0xff]  ;;  %s1283_s2 = sshll.u32 %s1739_s24, 7 }
  0xbe   : > { %1369 = vmatprep.subr.bf16.mxu0 %v1756_v0  ;;  %381 = vst.msk [vmem:[#allocation3] sm:$0xff] %vm378_vm3, %v1758_v1  ;;  %382 = vst.msk [vmem:[#allocation3 + $0x8] sm:$0xff] %vm378_vm3, %v1758_v1  ;;  %1495 = vset.pattern.permute.xlu0 %v1761_v27  ;;  %v926_v61 = vld [vmem:[#allocation13 + $0x8] sm:$0xff]  ;;  %s373_s13 = scalar_lea.vmem [#allocation14], %s2045_s3  ;;  %s2135_s11 = scalar_lea.hbm %s2191_s6, %s1283_s2 }
  0xbf   : > { %1496 = vset.pattern.permute.xlu1 %v1761_v27  ;;  %v1379_v62 = vpack.c.bf16 %v926_v61, %v925_v60  ;;  %s1118_s4 = sshll.u32 %s373_s13, 4  ;;  %s1104_s17 = scalar_lea.sflag [#allocation7], %s2042_s18  ;;  %s2137_s4 = int_to_ptr.vmem [resolvable:$true] %s1118_s4 }
  0xc0   : > { %1377 = vmatpush3.bf16.msra.mxu1 %v1376_v12  ;;  %s1653_s8 = scalar_lea.vmem %s2137_s4, 128  ;;  %p2220_p2 = scmp.ne.s32.totalorder %s2212_s30, 0 }
  0xc1   : > { %1371 = vmatpush3.bf16.msra.mxu0 %v1370_v13  ;;  %1332 = vmatprep.subr.mxu1 %v1758_v1  ;;  %p1654_p0 = scmp.ne.s32.totalorder %s2137_s4, %s1653_s8  ;;  %s1764_s24 = smov [#allocation14]  }
  0xc2   : > { %1342 = vmatprep.subr.mxu0 %v1758_v1  ;;  %v646_v2 = vld [vmem:[#allocation4] sm:$0xff]  ;;  %s1657_s3 = sshll.u32 %s1764_s24, 4  ;;  %s1658_s3 = int_to_ptr.vmem [resolvable:$false] %s1657_s3 }
  0xc3   : > { %1330 = vmatmul.mubr.msk.f32.vlgmr.msra.gmra.mrb[0].mxu1 %vm392_vm1, %v387_v14  ;;  %v928_v14 = vld [vmem:[#allocation13 + $0x18] sm:$0xff]  ;;  %p1655_p4 = pnand %p1654_p0, %p2220_p2  ;;  %s1659_s12 = scalar_lea.vmem %s1658_s3, 256 }
  0xc4   : > { %1319 = vmatmul.mubr.msk.f32.vlgmr.msra.gmra.mrb[0].mxu0 %vm392_vm1, %v386_v15  ;;  %1334 = vmatprep.mubr.msk.f32.mxu1 %vm1757_vm0, %v1758_v1  ;;  %v621_v31 = vld [vmem:[#allocation2] sm:$0xff]  ;;  %v811_v35 = vld [vmem:[#allocation2 + $0x8] sm:$0xff]  ;;  %p1660_p1 = scmp.lt.s32.totalorder %s2137_s4, %s1658_s3  ;;  %p1661_p13 = scmp.lt.s32.totalorder %s1659_s12, %s1653_s8 }
  0xc5   : > { %1344 = vmatprep.mubr.msk.f32.mxu0 %vm1757_vm0, %v1758_v1  ;;  %v638_v55 = vld [vmem:[#allocation3] sm:$0xff]  ;;  %v828_v8 = vld [vmem:[#allocation3 + $0x8] sm:$0xff]  ;;  %p1656_p8 = pneg %p1655_p4 }
  0xc6   : > { %p1662_p3 = por %p1661_p13, %p1660_p1 }
  0xc8   : > { %p1663_p5 = pnand %p1662_p3, %p1656_p8 }
 0x196   : > { %v540_v16 = vpop.f32.mrb[0].mxu1 }
 0x197   : > { %734 = vrot.lane.b32.xlu0 %v540_v16, %s1759_s27  ;;  %v462_v17 = vpop.f32.mrb[0].mxu0  ;;  %v1331_v18 = vpop.f32.mrb[1].mxu1  ;;  %1333 = vmatpush3.xpose.msk.msra.mxu1 %vm383_vm2, %v540_v16 }
 0x198   : > { %v466_v19 = vmul.f32 0.25, %v462_v17  ;;  %v1320_v20 = vpop.f32.mrb[1].mxu0  ;;  %1337 = vmatprep.subr.mxu1 %v1758_v1 }
 0x19a   : > { %1335 = vmatmul.mubr.msk.f32.vlgmr.msra.gmra.mrb[2].mxu1 %vm383_vm2, %v466_v19 }
 0x19b   : > { %732 = vrot.lane.b32.xlu0 %v466_v19, %s1759_s27  ;;  %1339 = vmatprep.mubr.msk.f32.mxu1 %vm1757_vm0, %v1758_v1  ;;  %v836_v19 = vld [vmem:[#allocation4 + $0x8] sm:$0xff] }
 0x209   : > { %v735_v21 = vpop.permute.xlu0 %734 }
 0x20a   : > { %1343 = vmatpush3.xpose.msk.msra.mxu0 %vm383_vm2, %v735_v21 }
 0x20b   : > { %1378 = vmatprep.subr.bf16.mxu0 %v1756_v0 }
 0x20d   : > { %v733_v22 = vpop.permute.xlu0 %732 }
 0x20e   : > { %1345 = vmatmul.mubr.msk.f32.vlgmr.msra.gmra.mrb[2].mxu0 %vm383_vm2, %v733_v22 }
 0x20f   : > { %1356 = vmatprep.mubr.msk.f32.mxu0 %vm1757_vm0, %v1758_v1  ;;  %1380 = vmatpush3.bf16.msra.mxu0 %v1379_v62 }
 0x210   : > { %1381 = vmatprep.subr.bf16.mxu0 %v1756_v0  ;;  %v927_v0 = vld [vmem:[#allocation13 + $0x10] sm:$0xff] }
 0x211   : > { %v1382_v17 = vpack.c.bf16 %v928_v14, %v927_v0 }
 0x26d   : > { %v617_v24 = vpop.f32.mrb[2].mxu1 }
 0x26e   : > { %v1336_v25 = vpop.f32.mrb[3].mxu1  ;;  %v623_v26 = vsel %vm622_vm4, %v617_v24, -inf }
 0x26f   : > { %624 = vmax.xlane.f32.xlu1 %v623_v26 }
 0x2e1   : > { %v806_v28 = vpop.f32.mrb[2].mxu0 }
 0x2e2   : > { %v1346_v29 = vpop.f32.mrb[3].mxu0  ;;  %v812_v30 = vsel %vm622_vm4, %v806_v28, -inf }
 0x2e3   : > { %813 = vmax.xlane.f32.xlu1 %v812_v30 }
 0x2fc   : > { %v625_v32 = vpop.xlane.xlu1 %624 }
 0x2fd   : > { %v626_v33 = vmax.f32 %v621_v31, %v625_v32 }
 0x2ff   : > { %v627_v34 = vsub.f32 %v621_v31, %v626_v33  ;;  %731 = vst.msk [vmem:[#allocation2] sm:$0xff] %vm378_vm3, %v626_v33  ;;  %632 = vperm.xlu0 %1495, %v626_v33  }
 0x301   : > { %v628_v46 = vmul.f32 1.442695, %v627_v34 }
 0x303   : > { %653 = vrot.lane.b32.xlu0 %v540_v16, %s1762_s29 }
 0x307   : > { %843 = vrot.lane.b32.xlu0 %v540_v16, %s1763_s21 }
 0x370   : > { %v814_v36 = vpop.xlane.xlu1 %813 }
 0x371   : > { %v815_v37 = vmax.f32 %v811_v35, %v814_v36 }
 0x373   : > { %v816_v38 = vsub.f32 %v811_v35, %v815_v37  ;;  %921 = vst.msk [vmem:[#allocation2 + $0x8] sm:$0xff] %vm378_vm3, %v815_v37  ;;  %821 = vperm.xlu1 %1496, %v815_v37  }
 0x375   : > { %v817_v53 = vmul.f32 1.442695, %v816_v38 }
 0x37e   : > { %v633_v39 = vpop.permute.xlu0 %632 }
 0x37f   : > { %v635_v40 = vsub.f32 %v617_v24, %v633_v39 }
 0x381   : > { %v636_v41 = vmul.f32 1.442695, %v635_v40 }
 0x382   : > { %v654_v42 = vpop.permute.xlu0 %653 }
 0x383   : > { %1497 = vpow2.f32 %v636_v41  ;;  %1338 = vmatpush3.msra.mxu1 %v654_v42 }
 0x384   : > { %1347 = vmatprep.subr.mxu1 %v1758_v1  ;;  %1499 = vpow2.f32 %v628_v46 }
 0x386   : > { %v844_v44 = vpop.permute.xlu0 %843 }
 0x38d   : > { %v1498_v43 = vpop.eup %1497 }
 0x38e   : > { %1340 = vmatmul.mubr.msk.f32.vlgmr.msra.gmra.mrb[4].mxu1 %vm622_vm4, %v1498_v43  ;;  %v640_v45 = vsel %vm622_vm4, %v1498_v43, 0.0  ;;  %v1500_v47 = vpop.eup %1499 }
 0x38f   : > { %1348 = vmatpush3.msra.mxu1 %v844_v44  ;;  %641 = vadd.xlane.f32.xlu0 %v640_v45  ;;  %v639_v56 = vmul.f32 %v1500_v47, %v638_v55 }
 0x390   : > { %1349 = vmatprep.mubr.msk.f32.mxu1 %vm1757_vm0, %v1758_v1 }
 0x3a5   : > { %649 = vperm.xlu0 %1495, %v1500_v47  }
 0x3f2   : > { %v822_v48 = vpop.permute.xlu1 %821 }
 0x3f3   : > { %v824_v49 = vsub.f32 %v806_v28, %v822_v48  ;;  %v1279_v28 = vld [vmem:[%s2190_s5] ss:$0 sm:$0xff] }
 0x3f5   : > { %v825_v50 = vmul.f32 1.442695, %v824_v49 }
 0x3f7   : > { %1501 = vpow2.f32 %v825_v50 }
 0x3f8   : > { %1503 = vpow2.f32 %v817_v53 }
 0x401   : > { %v1502_v51 = vpop.eup %1501 }
 0x402   : > { %1350 = vmatmul.mubr.msk.f32.vlgmr.msra.gmra.mrb[6].mxu1 %vm622_vm4, %v1502_v51  ;;  %v830_v52 = vsel %vm622_vm4, %v1502_v51, 0.0  ;;  %v1504_v54 = vpop.eup %1503 }
 0x403   : > { %831 = vadd.xlane.f32.xlu1 %v830_v52  ;;  %v829_v9 = vmul.f32 %v1504_v54, %v828_v8 }
 0x414   : > { %839 = vperm.xlu1 %1496, %v1504_v54  }
 0x41c   : > { %v642_v57 = vpop.xlane.xlu0 %641 }
 0x41d   : > { %v643_v58 = vadd.f32 %v642_v57, %v639_v56 }
 0x41f   : > { %645 = vst.msk [vmem:[#allocation3] sm:$0xff] %vm378_vm3, %v643_v58 }
 0x424   : > { %v650_v3 = vpop.permute.xlu0 %649 }
 0x425   : > { %v652_v4 = vmul.f32 %v650_v3, %v646_v2 }
 0x426   : > { %v936_v59 = vld [vmem:[#allocation3] sm:$0xff] }
 0x427   : > { %1505 = vrcp.f32 %v936_v59 }
 0x431   : > { %v1506_v63 = vpop.eup %1505 }
 0x432   : > { %941 = vperm.xlu0 %1495, %v1506_v63  }
 0x461   : > { %v725_v5 = vpop.f32.mrb[4].mxu1 }
 0x462   : > { %v729_v6 = vadd.f32 %v725_v5, %v652_v4  ;;  %v1341_v7 = vpop.f32.mrb[5].mxu1 }
 0x464   : > { %730 = vst.msk [vmem:[#allocation4] sm:$0xff] %vm383_vm2, %v729_v6 }
 0x46b   : > { %v938_v15 = vld [vmem:[#allocation4] sm:$0xff] }
 0x490   : > { %v832_v10 = vpop.xlane.xlu1 %831 }
 0x491   : > { %v833_v11 = vadd.f32 %v832_v10, %v829_v9 }
 0x493   : > { %834 = vst.msk [vmem:[#allocation3 + $0x8] sm:$0xff] %vm378_vm3, %v833_v11 }
 0x494   : > { %v840_v20 = vpop.permute.xlu1 %839 }
 0x495   : > { %v842_v21 = vmul.f32 %v840_v20, %v836_v19 }
 0x49a   : > { %v1019_v12 = vld [vmem:[#allocation3 + $0x8] sm:$0xff] }
 0x49b   : > { %1507 = vrcp.f32 %v1019_v12 }
 0x4a5   : > { %v1508_v13 = vpop.eup %1507 }
 0x4a6   : > { %1024 = vperm.xlu1 %1496, %v1508_v13  }
 0x4b1   : > { %v942_v16 = vpop.permute.xlu0 %941 }
 0x4b2   : > { %v944_v18 = vmul.f32 %v942_v16, %v938_v15 }
 0x4b4   : > { %1357 = vmatmul.mubr.msk.f32.vlgmr.msra.gmra.mrb[4].mxu0 %vm383_vm2, %v944_v18 }
 0x4b5   : > { %1383 = vmatpush3.bf16.msra.mxu0 %v1382_v17  ;;  %1363 = vmatprep.mubr.msk.f32.mxu0 %vm1757_vm0, %v1758_v1 }
 0x4d5   : > { %v915_v22 = vpop.f32.mrb[6].mxu1 }
 0x4d6   : > { %v919_v23 = vadd.f32 %v915_v22, %v842_v21  ;;  %v1351_v24 = vpop.f32.mrb[7].mxu1 }
 0x4d8   : > { %920 = vst.msk [vmem:[#allocation4 + $0x8] sm:$0xff] %vm383_vm2, %v919_v23 }
 0x4df   : > { %v1021_v26 = vld [vmem:[#allocation4 + $0x8] sm:$0xff] }
 0x525   : > { %v1025_v25 = vpop.permute.xlu1 %1024 }
 0x526   : > { %v1027_v27 = vmul.f32 %v1025_v25, %v1021_v26 }
 0x528   : > { %1364 = vmatmul.mubr.msk.f32.vlgmr.msra.gmra.mrb[4].mxu0 %vm383_vm2, %v1027_v27 }
 0x5fb   : > { %v1097_v1 = vpop.f32.mrb[4].mxu0 }
 0x5fc   : > { %v1384_v29 = vadd.f32 %v1279_v28, %v1097_v1  ;;  %v1365_v30 = vpop.f32.mrb[5].mxu0 }
 0x5fe   : > { %1102 = vst.msk [vmem:[%s373_s13] sm:$0xff] %vm392_vm1, %v1384_v29 }
 0x5ff   : > { %1666 = shalt.err (!%p1663_p5)
}
 0x600   : > { %s1667_s18 = scalar_lea.hbm %s2135_s11, 128  ;;  %s1671_s20 = scalar_lea.hbm %s2191_s6, 256 }
 0x601   : > { %p1668_p6 = scmp.ne.s32.totalorder %s2135_s11, %s1667_s18  ;;  %p1672_p12 = scmp.lt.u32.totalorder %s2135_s11, %s2191_s6 }
 0x602   : > { %p1673_p11 = scmp.lt.u32.totalorder %s1671_s20, %s1667_s18  ;;  %p1675_p0 = scmp.lt.u32.totalorder %s1667_s18, %s2135_s11 }
 0x603   : > { %p1669_p10 = pnand %p1668_p6, %p2220_p2 }
 0x604   : > { %p1674_p9 = por %p1673_p11, %p1672_p12 }
 0x605   : > { %p1670_p7 = pneg %p1669_p10 }
 0x606   : > { %p1676_p4 = por %p1675_p0, %p1674_p9 }
 0x608   : > { %p1677_p8 = pnand %p1676_p4, %p1670_p7 }
 0x60a   : > { %1680 = shalt.err (!%p1677_p8)
}
 0x60b   : > { %1403 = dma.vmem_to_hbm [thread:$0]  (%p2220_p2), %s2137_s4, 128, %s2135_s11, %s1104_s17  }
 0x60c PF: > { %s2221_s21 = sld [smem:[#allocation20_spill]]  ;;  %s2222_s19 = sld [smem:[#allocation21_spill]] }
 0x60d   : > { %p2224_p13 = scmp.ge.s32.totalorder %s1747_s26, 2 }
 0x612   : > { %s1130_s16 = sand.u32 1, %s2221_s21   ;;  %p2223_p1 = scmp.ne.s32.totalorder %s2222_s19, 0 }
 0x613   : > { %s1131_s2 = scalar_lea.sflag [#allocation7], %s1130_s16 }
 0x614   : > { %p1423_p3 = pnand %p2224_p13, %p2223_p1 }
 0x616   : > { %1722 = dma.done.wait (!%p1423_p3), %s1131_s2, 128  }
 0x617   : > { %1724 = vsyncadd (!%p1423_p3), %s1131_s2, 4294967168  ;;  %s26_s26 = sadd.s32 1, %s1747_s26   ;;  %s2225_s21 = smov %s1731_s22 }
 0x618   : > { %p23_p5 = scmp.ge.s32.totalorder %s26_s26, 4   ;;  %s2226_s22 = smov %s1735_s23 }
 0x619   : > { %s2227_s23 = smov %s1970_s15  ;;  %s2228_s24 = smov %s1743_s25 }
 0x61a   : > { %s2229_s25 = smov %s2231_s10  ;;  %25 = sbr.rel (!%p23_p5) target bundleno = 13 (0xd), region = 125 }
 0x621   :  { %1136 = vsyncpa [#allocation6], 1 }
 0x622   :  { %1138 = vsyncpa [#allocation6 + $0x1], 1 }
 0x623   :  { %1139 = vsyncpa [#allocation9], 1 }
 0x624   :  { %1141 = vsyncpa [#allocation9 + $0x1], 1 }
 0x625   :  { %1142 = vsyncpa [#allocation12], 1 }
 0x626   :  { %1143 = vsyncpa [#allocation7], 1 }
 0x627   :  { %1145 = vsyncpa [#allocation7 + $0x1], 1 }

</bundles_post_ra>
